<compile_context>
chip_gen: v7x
topology: tpu7x:2x2x1
jax: 0.10.0
libtpu: 0.0.40
codegen_flags: <defaults>
</compile_context>

<pallas_src>
import functools

import jax
import jax.numpy as jnp
from jax.experimental import pallas as pl
from jax.experimental.pallas import tpu as pltpu


def _round_up(n, m):
    return ((n + m - 1) // m) * m


def _cdiv(a, b):
    return (a + b - 1) // b


def _choose_tile_rows(n, tm_cap):
    """Pick (tile_m, n_steps) for the row grid.

    * tile_m is a multiple of 16 (bf16 sublane packing for the output block;
      also satisfies the f32 input's multiple-of-8 requirement).
    * n <= 512: one tile (launch overhead dominates, splitting never helps).
    * n  > 512: at least 2 steps so v7x's two TensorCores both get work,
      more if n exceeds the tile cap.
    """
    if n <= 512:
        return _round_up(n, 16), 1
    n_steps = max(2, _cdiv(n, tm_cap))
    tile_m = _round_up(_cdiv(n, n_steps), 16)
    return tile_m, _cdiv(n, tile_m)


def _resident_spec(block_shape):
    """Weight/bias stay pinned in VMEM (constant index_map); single buffer."""
    index_map = lambda i: (0, 0)
    try:
        return pl.BlockSpec(block_shape, index_map,
                            pipeline_mode=pl.Buffered(1))
    except TypeError:  # older JAX without pipeline_mode kwarg
        return pl.BlockSpec(block_shape, index_map)


def gmm_linear_kernel(x_ref, w_ref, b_ref, o_ref):
    # f32 x tile cast to bf16 in-register (VALU has huge slack), MXU matmul
    # with f32 accumulation, f32 bias-add epilogue, bf16 store.
    x_bf = x_ref[...].astype(jnp.bfloat16)
    acc = jnp.dot(x_bf, w_ref[...], preferred_element_type=jnp.float32)
    o_ref[...] = (acc + b_ref[...]).astype(o_ref.dtype)


@functools.partial(jax.jit,
                   static_argnames=("out_features", "tm", "out_dtype"))
def gmm_linear_padded(x2d, w_ho_pad, b_pad, *, out_features, tm=1024,
                      out_dtype=jnp.bfloat16):
    """y = x2d @ W + b with W pre-transposed/zero-padded to (H, O_pad).

    x2d:      (N, H)       float32 (cast to bf16 inside the kernel)
    w_ho_pad: (H, O_pad)   bfloat16, O_pad % 128 == 0, zero-padded columns
    b_pad:    (1, O_pad)   float32, zero-padded
    returns   (N, out_features) out_dtype (bfloat16 by default)
    """
    n, h = x2d.shape
    o_pad = w_ho_pad.shape[1]

    tile_m, n_steps = _choose_tile_rows(n, tm)

    out = pl.pallas_call(
        gmm_linear_kernel,
        out_shape=jax.ShapeDtypeStruct((n, o_pad), out_dtype),
        grid=(n_steps,),
        in_specs=[
            pl.BlockSpec((tile_m, h), lambda i: (i, 0)),   # stream row tiles
            _resident_spec((h, o_pad)),                    # weight resident
            _resident_spec((1, o_pad)),                    # bias resident
        ],
        out_specs=pl.BlockSpec((tile_m, o_pad), lambda i: (i, 0)),
        compiler_params=pltpu.CompilerParams(
            dimension_semantics=("parallel",)),
    )(x2d, w_ho_pad, b_pad)

    return out[:, :out_features]


class MDRNNBasePallas:
    """Mirror of _MDRNNBase.__init__ with deterministic parameter init."""

    def __init__(self, latents, actions, hiddens, gaussians, key):
        self.latents = latents
        self.actions = actions
        self.hiddens = hiddens
        self.gaussians = gaussians
        self.out_features = (2 * latents + 1) * gaussians + 2
        o_pad = _round_up(self.out_features, 128)

        # PyTorch nn.Linear default init: U(-1/sqrt(in), 1/sqrt(in)),
        # kept in PyTorch (O, H) layout for reference checking.
        kw, kb = jax.random.split(key)
        bound = 1.0 / (hiddens ** 0.5)
        self.gmm_weight = jax.random.uniform(
            kw, (self.out_features, hiddens), jnp.float32, -bound, bound)
        self.gmm_bias = jax.random.uniform(
            kb, (self.out_features,), jnp.float32, -bound, bound)

        # Hoisted, kernel-ready parameters (built once, NOT per forward call):
        # weight transposed to (H, O), zero-padded to O_pad lanes, bf16;
        # bias reshaped to (1, O_pad), f32 for the epilogue add.
        w_ho = jnp.zeros((hiddens, o_pad), jnp.float32)
        w_ho = w_ho.at[:, : self.out_features].set(self.gmm_weight.T)
        self.w_ho_pad = w_ho.astype(jnp.bfloat16)
        b = jnp.zeros((1, o_pad), jnp.float32)
        self.b_pad = b.at[0, : self.out_features].set(self.gmm_bias)

    def __call__(self, hidden_states):
        # Base-class forward() is `pass` in PyTorch; this applies the
        # gmm_linear head (what every subclass forward does with it).
        # TODO(synk): for MDRNNCell's per-timestep path, fuse this projection
        # into the LSTM-step kernel (h still resident in VMEM) instead of a
        # standalone pallas_call; at N = batch the launch overhead dominates.
        lead = hidden_states.shape[:-1]
        x2d = hidden_states.reshape(-1, self.hiddens)
        y = gmm_linear_padded(x2d, self.w_ho_pad, self.b_pad,
                              out_features=self.out_features)
        return y.reshape(*lead, self.out_features)


def _reference(model, x):
    """nn.Linear semantics with the kernel's bf16 operand/output rounding."""
    x_bf = x.reshape(-1, model.hiddens).astype(jnp.bfloat16).astype(jnp.float32)
    w_bf = model.gmm_weight.astype(jnp.bfloat16).astype(jnp.float32)
    ref = x_bf @ w_bf.T + model.gmm_bias
    ref = ref.astype(jnp.bfloat16).astype(jnp.float32)
    return ref.reshape(*x.shape[:-1], model.out_features)


if __name__ == "__main__":
    latents, actions, hiddens, gaussians = 8, 3, 32, 5
    seq, batch = 8, 2
    out_features = (2 * latents + 1) * gaussians + 2

    key = jax.random.PRNGKey(0)
    k_params, k_x, k_x2 = jax.random.split(key, 3)

    model = MDRNNBasePallas(latents, actions, hiddens, gaussians, k_params)

    # (SEQ, BSIZE, H) hidden states; flattened to one big row axis internally.
    x = jax.random.normal(k_x, (seq, batch, hiddens), jnp.float32)
    out = jax.block_until_ready(model(x))
    assert out.shape == (seq, batch, out_features)
    ref = _reference(model, x)
    assert jnp.allclose(out.astype(jnp.float32), ref, atol=3e-2, rtol=3e-2)

    # Second check exercises the multi-step "parallel" grid with a ragged
    # last row tile (n = 521 > 512 -> 2 steps, no wrapper-side padding).
    x2 = jax.random.normal(k_x2, (521, hiddens), jnp.float32)
    out2 = jax.block_until_ready(model(x2))
    assert out2.shape == (521, out_features)
    ref2 = _reference(model, x2)
    assert jnp.allclose(out2.astype(jnp.float32), ref2, atol=3e-2, rtol=3e-2)

    print("KERNEL_OK")
</pallas_src>

<mosaic_0001>
module attributes {stable_mosaic.version = 11 : i64} {
  func.func @gmm_linear_kernel(%arg0: i32, %arg1: memref<16x32xf32, #tpu.memory_space<vmem>>, %arg2: memref<32x128xbf16, #tpu.memory_space<vmem>>, %arg3: memref<1x128xf32, #tpu.memory_space<vmem>>, %arg4: memref<16x128xbf16, #tpu.memory_space<vmem>>) attributes {dimension_semantics = [#tpu.dimension_semantics<parallel>], iteration_bounds = array<i64: 1>, scalar_prefetch = 0 : i64, scratch_operands = 0 : i64, tpu.core_type = #tpu.core_type<tc>, window_params = [{transform_indices = @transform_0, window_bounds = array<i64: 16, 32>}, {pipeline_mode = #tpu.pipeline_mode<synchronous>, transform_indices = @transform_1, window_bounds = array<i64: 32, 128>}, {pipeline_mode = #tpu.pipeline_mode<synchronous>, transform_indices = @transform_2, window_bounds = array<i64: 1, 128>}, {transform_indices = @transform_3, window_bounds = array<i64: 16, 128>}]} {
    %c0 = arith.constant 0 : index
    %c0_0 = arith.constant 0 : index
    %0 = vector.load %arg1[%c0, %c0_0] : memref<16x32xf32, #tpu.memory_space<vmem>>, vector<16x32xf32>
    %1 = arith.truncf %0 : vector<16x32xf32> to vector<16x32xbf16>
    %c0_1 = arith.constant 0 : index
    %c0_2 = arith.constant 0 : index
    %2 = vector.load %arg2[%c0_1, %c0_2] : memref<32x128xbf16, #tpu.memory_space<vmem>>, vector<32x128xbf16>
    %cst = arith.constant dense<0.000000e+00> : vector<16x128xf32>
    %3 = tpu.matmul %1, %2, %cst {dimension_numbers = #tpu.dot_dimension_numbers<[1], [0], [0], [1], [0, 0, 1, 1], [], []>} : vector<16x32xbf16>, vector<32x128xbf16>, vector<16x128xf32> -> vector<16x128xf32>
    %c0_3 = arith.constant 0 : index
    %c0_4 = arith.constant 0 : index
    %4 = vector.load %arg3[%c0_3, %c0_4] : memref<1x128xf32, #tpu.memory_space<vmem>>, vector<1x128xf32>
    %5 = vector.broadcast %4 : vector<1x128xf32> to vector<16x128xf32>
    %6 = arith.addf %3, %5 : vector<16x128xf32>
    %7 = arith.truncf %6 : vector<16x128xf32> to vector<16x128xbf16>
    %c0_5 = arith.constant 0 : index
    %c0_6 = arith.constant 0 : index
    %8 = vector.load %arg4[%c0_5, %c0_6] : memref<16x128xbf16, #tpu.memory_space<vmem>>, vector<16x128xbf16>
    tpu.vector_store %arg4[%c0_5, %c0_6], %7 {strides = array<i32>} : memref<16x128xbf16, #tpu.memory_space<vmem>>, vector<16x128xbf16>,
    return
  }
  func.func @transform_0(%arg0: i32) -> (i32, i32) {
    %c0_i32 = arith.constant 0 : i32
    %c0_i32_0 = arith.constant 0 : i32
    return %arg0, %c0_i32 : i32, i32
  }
  func.func @transform_1(%arg0: i32) -> (i32, i32) {
    %c0_i32 = arith.constant 0 : i32
    %c0_i32_0 = arith.constant 0 : i32
    %c0_i32_1 = arith.constant 0 : i32
    return %c0_i32, %c0_i32_0 : i32, i32
  }
  func.func @transform_2(%arg0: i32) -> (i32, i32) {
    %c0_i32 = arith.constant 0 : i32
    %c0_i32_0 = arith.constant 0 : i32
    %c0_i32_1 = arith.constant 0 : i32
    return %c0_i32, %c0_i32_0 : i32, i32
  }
  func.func @transform_3(%arg0: i32) -> (i32, i32) {
    %c0_i32 = arith.constant 0 : i32
    %c0_i32_0 = arith.constant 0 : i32
    return %arg0, %c0_i32 : i32, i32
  }
}

</mosaic_0001>

<bundles_post_ra>
// kernel: gmm_linear_padded.1
= control target key start
LH: loop header
LB: loop body
LE: loop exit
PB: predicated region body
PF: predicated region fallthrough
CT: control target
= control target key end

     0   :  { %8 = vsyncpa [#allocation3], 0  ;;  %s324_s0 = inlined_call_operand.hbm [shape: f32[16,32], index: 0, kind: input, shape index: {}]   ;;  %s325_s1 = inlined_call_operand.hbm [shape: bf16[32,128], index: 1, kind: input, shape index: {}]   ;;  %s326_s2 = inlined_call_operand.vmem [shape: f32[1,128], index: 2, kind: input, shape index: {}]   ;;  %s327_s3 = inlined_call_operand.hbm [shape: bf16[16,128], index: 3, kind: output, shape index: {}]  }
   0x1   :  { %9 = vsyncpa [#allocation6], 0 }
   0x2   :  { %10 = vsyncpa [#allocation4], 0  ;;  %s250_s12 = smov [#allocation2]   ;;  %s178_s16 = scalar_lea.hbm %s324_s0, 256 }
   0x3   :  { %s16_s13 = sshll.u32 %s250_s12, 4  ;;  %p179_p0 = scmp.ne.s32.totalorder %s324_s0, %s178_s16  ;;  %s17_s13 = int_to_ptr.vmem [resolvable:$true] %s16_s13 }
   0x4   :  { %p182_p1 = scmp.lt.u32.totalorder %s178_s16, %s324_s0 }
   0x6   :  { %p184_p2 = pnand %p182_p1, %p179_p0 }
   0x8   :  { %187 = shalt.err (!%p184_p2)
}
   0x9   :  { %s188_s21 = scalar_lea.vmem %s17_s13, 256  ;;  %p193_p4 = scmp.lt.s32.totalorder %s17_s13, %s17_s13 }
   0xa   :  { %p189_p3 = scmp.ne.s32.totalorder %s17_s13, %s188_s21  ;;  %p194_p5 = scmp.lt.s32.totalorder %s188_s21, %s188_s21 }
   0xc   :  { %p195_p6 = por %p194_p5, %p193_p4 }
   0xe   :  { %p196_p7 = pnand %p195_p6, %p189_p3 }
  0x10   :  { %199 = shalt.err (!%p196_p7)
}
  0x11   :  { %s251_s22 = smov 128   ;;  %s252_s23 = smov 8  }
  0x12   :  { %22 = dma.hbm_to_vmem [thread:$0]  %s324_s0, 256, %s17_s13, [#allocation3], %s251_s22, %s251_s22, %s252_s23  }
  0x13   :  { %s253_s26 = smov [#allocation5]   ;;  %s200_s30 = scalar_lea.hbm %s325_s1, 256 }
  0x14   :  { %s28_s27 = sshll.u32 %s253_s26, 4  ;;  %p201_p8 = scmp.ne.s32.totalorder %s325_s1, %s200_s30  ;;  %s29_s27 = int_to_ptr.vmem [resolvable:$true] %s28_s27 }
  0x15   :  { %p204_p9 = scmp.lt.u32.totalorder %s200_s30, %s325_s1 }
  0x17   :  { %p206_p10 = pnand %p204_p9, %p201_p8 }
  0x19   :  { %209 = shalt.err (!%p206_p10)
}
  0x1a   :  { %s210_s8 = scalar_lea.vmem %s29_s27, 256  ;;  %p215_p12 = scmp.lt.s32.totalorder %s29_s27, %s29_s27 }
  0x1b   :  { %p211_p11 = scmp.ne.s32.totalorder %s29_s27, %s210_s8  ;;  %p216_p13 = scmp.lt.s32.totalorder %s210_s8, %s210_s8 }
  0x1d   :  { %p217_p0 = por %p216_p13, %p215_p12 }
  0x1f   :  { %p218_p1 = pnand %p217_p0, %p211_p11 }
  0x21   :  { %221 = shalt.err (!%p218_p1)
}
  0x22   :  { %s254_s0 = smov 64   ;;  %s255_s9 = smov 4  }
  0x23   :  { %34 = dma.hbm_to_vmem [thread:$0]  %s325_s1, 256, %s29_s27, [#allocation6], %s254_s0, %s254_s0, %s255_s9  }
  0x24   :  { %244 = dma.done.wait [#allocation3], 256  }
  0x25   :  { %245 = vsyncadd [#allocation3], 4294967040 }
  0x26   :  { %246 = dma.done.wait [#allocation6], 256  }
  0x27   :  { %247 = vsyncadd [#allocation6], 4294967040  ;;  %v256_v0 = vmov 0.0   ;;  %vm257_vm0 = vmmov 0   ;;  %v176_v1 = vld [vmem:[#allocation5] sm:$0xff]   ;;  %v177_v2 = vld [vmem:[#allocation5 + $0x8] sm:$0xff]  }
  0x28   :  { %159 = vmatprep.subr.bf16.mxu0 %v256_v0  ;;  %163 = vmatprep.mubr.msk.bf16.mxu0 %vm257_vm0, %v256_v0  ;;  %v44_v3 = vld [vmem:[#allocation2] sm:$0xff]  ;;  %v45_v4 = vld [vmem:[#allocation2 + $0x8] sm:$0xff]  ;;  %vm70_vm1 = vcmask 261120   ;;  %s258_s13 = smov [#allocation7]  }
  0x29   :  { %160 = vmatpush3.bf16.msra.mxu0 %v176_v1  ;;  %v46_v5 = vpack.c.bf16 %v45_v4, %v44_v3  ;;  %v143_v6 = vld [vmem:[%s326_s2] ss:$0 sm:$0xff]  ;;  %s130_s14 = sshll.u32 %s258_s13, 4  ;;  %s131_s14 = int_to_ptr.vmem [resolvable:$true] %s130_s14 }
  0x2a   :  { %161 = vmatprep.subr.bf16.mxu0 %v256_v0  ;;  %s222_s15 = scalar_lea.vmem %s131_s14, 128  ;;  %p227_p3 = scmp.lt.s32.totalorder %s131_s14, %s131_s14 }
  0x2b   :  { %p223_p2 = scmp.ne.s32.totalorder %s131_s14, %s222_s15  ;;  %p228_p4 = scmp.lt.s32.totalorder %s222_s15, %s222_s15 }
  0x2d   :  { %162 = vmatpush3.bf16.msra.mxu0 %v177_v2  ;;  %p229_p5 = por %p228_p4, %p227_p3 }
  0x2f   :  { %p230_p6 = pnand %p229_p5, %p223_p2 }
  0x30   :  { %164 = vmatmul.mubr.msk.bf16.vlgmr.msra.gmra.mrb[0].mxu0 %vm70_vm1, %v46_v5 }
 0x103   :  { %v108_v7 = vpop.f32.mrb[0].mxu0 }
 0x104   :  { %v165_v8 = vpop.f32.mrb[1].mxu0  ;;  %v109_v10 = vadd.f32 %v143_v6, %v108_v7 }
 0x105   :  { %v111_v9 = vpop.f32.mrb[2].mxu0 }
 0x106   :  { %v112_v11 = vadd.f32 %v143_v6, %v111_v9  ;;  %v166_v12 = vpop.f32.mrb[3].mxu0 }
 0x108   :  { %v154_v13 = vpack.c.bf16 %v112_v11, %v109_v10 }
 0x10a   :  { %155 = vst [vmem:[#allocation7] sm:$0xff] %v154_v13  }
 0x10b   :  { %233 = shalt.err (!%p230_p6)
}
 0x10c   :  { %s234_s17 = scalar_lea.hbm %s327_s3, 128 }
 0x10d   :  { %p235_p7 = scmp.ne.s32.totalorder %s327_s3, %s234_s17  ;;  %p238_p8 = scmp.lt.u32.totalorder %s234_s17, %s327_s3 }
 0x10f   :  { %p240_p9 = pnand %p238_p8, %p235_p7 }
 0x111   :  { %243 = shalt.err (!%p240_p9)
}
 0x112   :  { %136 = dma.vmem_to_hbm [thread:$0]  %s131_s14, 128, %s327_s3, [#allocation4], %s254_s0, %s254_s0, %s255_s9  }
 0x113   :  { %248 = dma.done.wait [#allocation4], 128  }
 0x114   :  { %249 = vsyncadd [#allocation4], 4294967168 }
 0x115   :  { %140 = vsyncpa [#allocation3], 1 }
 0x116   :  { %141 = vsyncpa [#allocation6], 1 }
 0x117   :  { %142 = vsyncpa [#allocation4], 1 }

</bundles_post_ra>
